<compile_context>
chip_gen: v5e
topology: v5e:2x2
jax: 0.10.0
libtpu: 0.0.40
codegen_flags: <defaults>
</compile_context>

<pallas_src>
import jax
import jax.numpy as jnp
from jax.experimental import pallas as pl
from jax.experimental.pallas import tpu as pltpu

HIDDEN = 32
OUT_DIM = 32
KSIZE = 3


def _round_up(x, m):
    return ((x + m - 1) // m) * m


# -----------------------------------------------------------------------------
# Pallas kernel: one modality per grid step (grid=(2,), "parallel").
#   p_ref    : (1, K_pad, BHW_pad)   im2col patches, feature-major   (VMEM)
#   w1_ref   : (1, HIDDEN, K_pad)    conv weight as matmul           (VMEM)
#   b1_ref   : (1, HIDDEN, 1)        conv bias                       (VMEM)
#   w2_ref   : (1, OUT_DIM, HIDDEN)  fc weight (torch layout)        (VMEM)
#   b2_ref   : (1, OUT_DIM, 1)       fc bias                         (VMEM)
#   pool_ref : (1, BHW_pad, B)       per-modality mean-pool matrix   (VMEM)
#   o_ref    : (1, OUT_DIM, B)       output block for this modality  (VMEM)
# -----------------------------------------------------------------------------
def _bimodal_kernel(p_ref, w1_ref, b1_ref, w2_ref, b2_ref, pool_ref, o_ref):
    # Conv as matmul: (HIDDEN, K_pad) x (K_pad, BHW_pad) -> (HIDDEN, BHW_pad)
    h = jnp.dot(w1_ref[0], p_ref[0], preferred_element_type=jnp.float32)
    h = jnp.maximum(h + b1_ref[0], 0.0)                      # bias + ReLU (lane dense)
    # Global average pool as matmul: (HIDDEN, BHW_pad) x (BHW_pad, B) -> (HIDDEN, B)
    pooled = jnp.dot(h, pool_ref[0], preferred_element_type=jnp.float32)
    # FC head: (OUT_DIM, HIDDEN) x (HIDDEN, B) -> (OUT_DIM, B)
    out = jnp.dot(w2_ref[0], pooled, preferred_element_type=jnp.float32) + b2_ref[0]
    o_ref[0] = out.astype(o_ref.dtype)                       # full aligned block store


def _im2col_t(x, k=KSIZE, pad=1):
    """NCHW -> (C*k*k, B*H*W) patches, (c, kh, kw) ordering on the K axis."""
    B, C, H, W = x.shape
    xp = jnp.pad(x, ((0, 0), (0, 0), (pad, pad), (pad, pad)))
    cols = []
    for i in range(k):
        for j in range(k):
            cols.append(xp[:, :, i:i + H, j:j + W])           # (B, C, H, W)
    patches = jnp.stack(cols, axis=2)                         # (B, C, k*k, H, W)
    patches = patches.reshape(B, C * k * k, H * W)            # (B, K, HW)
    patches = jnp.transpose(patches, (1, 0, 2))               # (K, B, HW)
    return patches.reshape(C * k * k, B * H * W)              # (K, B*HW)


def bimodal_encoder(cfp_imgs, oct_imgs, params_cfp, params_oct):
    """Pallas equivalent of BimodalEncoder.forward -> (attn_cfp, attn_oct)."""
    B = cfp_imgs.shape[0]
    assert oct_imgs.shape[0] == B, "both modalities must share the batch size"

    modal_inputs = (cfp_imgs, oct_imgs)
    modal_params = (params_cfp, params_oct)

    Ks, BHWs = [], []
    for x in modal_inputs:
        _, C, H, W = x.shape
        Ks.append(C * KSIZE * KSIZE)
        BHWs.append(B * H * W)
    K_pad = _round_up(max(Ks), 8)          # sublane-aligned contraction dim
    BHW_pad = _round_up(max(BHWs), 128)    # lane-dense N dim

    patches_l, w1_l, b1_l, w2_l, b2_l, pool_l = [], [], [], [], [], []
    for x, (w_conv, b_conv, w_fc, b_fc) in zip(modal_inputs, modal_params):
        _, C, H, W = x.shape
        K = C * KSIZE * KSIZE
        HW = H * W

        p = _im2col_t(x)                                      # (K, B*HW)
        p = jnp.pad(p, ((0, K_pad - K), (0, BHW_pad - B * HW)))
        patches_l.append(p)

        # torch conv weight (O, C, kh, kw) -> (HIDDEN, K), zero-pad K
        w1 = w_conv.reshape(HIDDEN, K)
        w1_l.append(jnp.pad(w1, ((0, 0), (0, K_pad - K))))
        b1_l.append(b_conv.reshape(HIDDEN, 1))
        w2_l.append(w_fc)                                     # (OUT_DIM, HIDDEN)
        b2_l.append(b_fc.reshape(OUT_DIM, 1))

        # Mean-pool matrix: column b averages rows [b*HW, (b+1)*HW); padded
        # rows get weight 0 (SUM/HW stays exact despite zero padding).
        rows = jnp.arange(BHW_pad)
        cols = jnp.arange(B)
        sel = ((rows[:, None] // HW) == cols[None, :]) & (rows[:, None] < B * HW)
        pool_l.append(sel.astype(jnp.float32) / float(HW))

    patches_all = jnp.stack(patches_l)     # (2, K_pad, BHW_pad)
    w1_all = jnp.stack(w1_l)               # (2, HIDDEN, K_pad)
    b1_all = jnp.stack(b1_l)               # (2, HIDDEN, 1)
    w2_all = jnp.stack(w2_l)               # (2, OUT_DIM, HIDDEN)
    b2_all = jnp.stack(b2_l)               # (2, OUT_DIM, 1)
    pool_all = jnp.stack(pool_l)           # (2, BHW_pad, B)

    flops = 2 * 2 * (HIDDEN * K_pad * BHW_pad + HIDDEN * BHW_pad * B
                     + OUT_DIM * HIDDEN * B)
    bytes_accessed = 4 * (patches_all.size + w1_all.size + b1_all.size
                          + w2_all.size + b2_all.size + pool_all.size
                          + 2 * OUT_DIM * B)

    out = pl.pallas_call(
        _bimodal_kernel,
        out_shape=jax.ShapeDtypeStruct((2, OUT_DIM, B), jnp.float32),
        grid_spec=pltpu.PrefetchScalarGridSpec(
            num_scalar_prefetch=0,
            grid=(2,),                                        # one step per modality
            in_specs=[
                pl.BlockSpec((1, K_pad, BHW_pad), lambda m: (m, 0, 0)),
                pl.BlockSpec((1, HIDDEN, K_pad), lambda m: (m, 0, 0)),
                pl.BlockSpec((1, HIDDEN, 1), lambda m: (m, 0, 0)),
                pl.BlockSpec((1, OUT_DIM, HIDDEN), lambda m: (m, 0, 0)),
                pl.BlockSpec((1, OUT_DIM, 1), lambda m: (m, 0, 0)),
                pl.BlockSpec((1, BHW_pad, B), lambda m: (m, 0, 0)),
            ],
            out_specs=pl.BlockSpec((1, OUT_DIM, B), lambda m: (m, 0, 0)),
        ),
        compiler_params=pltpu.CompilerParams(
            dimension_semantics=("parallel",)),               # 2 TCs on v7x
        cost_estimate=pl.CostEstimate(flops=int(flops), transcendentals=0,
                                      bytes_accessed=int(bytes_accessed)),
    )(patches_all, w1_all, b1_all, w2_all, b2_all, pool_all)

    out = jnp.transpose(out, (0, 2, 1))                       # (2, B, OUT_DIM)
    return out[0], out[1]


def _init_encoder_params(key, c_in):
    """Deterministic synthetic weights (torch-layout shapes)."""
    k1, k2, k3, k4 = jax.random.split(key, 4)
    w_conv = jax.random.normal(k1, (HIDDEN, c_in, KSIZE, KSIZE),
                               jnp.float32) * 0.05
    b_conv = jax.random.normal(k2, (HIDDEN,), jnp.float32) * 0.05
    w_fc = jax.random.normal(k3, (OUT_DIM, HIDDEN), jnp.float32) * 0.05
    b_fc = jax.random.normal(k4, (OUT_DIM,), jnp.float32) * 0.05
    return (w_conv, b_conv, w_fc, b_fc)


# Pure-JAX reference of the same encoder, for a correctness sanity check.
def _ref_encoder(x, params):
    w_conv, b_conv, w_fc, b_fc = params
    y = jax.lax.conv_general_dilated(
        x, w_conv, window_strides=(1, 1), padding="SAME",
        dimension_numbers=("NCHW", "OIHW", "NCHW"))
    y = jnp.maximum(y + b_conv[None, :, None, None], 0.0)
    pooled = y.mean(axis=(2, 3))                              # [B, HIDDEN]
    return pooled @ w_fc.T + b_fc[None, :]


if __name__ == "__main__":
    key = jax.random.PRNGKey(0)
    k_cfp_x, k_oct_x, k_cfp_p, k_oct_p = jax.random.split(key, 4)

    B, H, W = 2, 16, 16
    C_CFP, C_OCT = 3, 1                                       # CFP: RGB, OCT: grayscale
    cfp_imgs = jax.random.normal(k_cfp_x, (B, C_CFP, H, W), jnp.float32)
    oct_imgs = jax.random.normal(k_oct_x, (B, C_OCT, H, W), jnp.float32)

    params_cfp = _init_encoder_params(k_cfp_p, C_CFP)
    params_oct = _init_encoder_params(k_oct_p, C_OCT)

    attn_cfp, attn_oct = jax.jit(bimodal_encoder)(
        cfp_imgs, oct_imgs, params_cfp, params_oct)
    jax.block_until_ready((attn_cfp, attn_oct))

    # sanity check against the pure-JAX reference
    ref_cfp = _ref_encoder(cfp_imgs, params_cfp)
    ref_oct = _ref_encoder(oct_imgs, params_oct)
    assert attn_cfp.shape == (B, OUT_DIM) and attn_oct.shape == (B, OUT_DIM)
    assert jnp.allclose(attn_cfp, ref_cfp, atol=1e-4, rtol=1e-4)
    assert jnp.allclose(attn_oct, ref_oct, atol=1e-4, rtol=1e-4)

    print("KERNEL_OK")
</pallas_src>

<mosaic_0001>
module attributes {stable_mosaic.version = 11 : i64} {
  func.func @_bimodal_kernel(%arg0: i32, %arg1: memref<1x32x512xf32, #tpu.memory_space<vmem>>, %arg2: memref<1x32x32xf32, #tpu.memory_space<vmem>>, %arg3: memref<1x32x1xf32, #tpu.memory_space<vmem>>, %arg4: memref<1x32x32xf32, #tpu.memory_space<vmem>>, %arg5: memref<1x32x1xf32, #tpu.memory_space<vmem>>, %arg6: memref<1x512x2xf32, #tpu.memory_space<vmem>>, %arg7: memref<1x32x2xf32, #tpu.memory_space<vmem>>) attributes {dimension_semantics = [#tpu.dimension_semantics<parallel>], iteration_bounds = array<i64: 2>, scalar_prefetch = 0 : i64, scratch_operands = 0 : i64, tpu.core_type = #tpu.core_type<tc>, window_params = [{transform_indices = @transform_0, window_bounds = array<i64: 1, 32, 512>}, {transform_indices = @transform_1, window_bounds = array<i64: 1, 32, 32>}, {transform_indices = @transform_2, window_bounds = array<i64: 1, 32, 1>}, {transform_indices = @transform_3, window_bounds = array<i64: 1, 32, 32>}, {transform_indices = @transform_4, window_bounds = array<i64: 1, 32, 1>}, {transform_indices = @transform_5, window_bounds = array<i64: 1, 512, 2>}, {transform_indices = @transform_6, window_bounds = array<i64: 1, 32, 2>}]} {
    %c0 = arith.constant 0 : index
    %c0_0 = arith.constant 0 : index
    %c0_1 = arith.constant 0 : index
    %0 = vector.load %arg2[%c0, %c0_0, %c0_1] : memref<1x32x32xf32, #tpu.memory_space<vmem>>, vector<1x32x32xf32>
    %1 = vector.shape_cast %0 : vector<1x32x32xf32> to vector<32x32xf32>
    %c0_2 = arith.constant 0 : index
    %c0_3 = arith.constant 0 : index
    %c0_4 = arith.constant 0 : index
    %2 = vector.load %arg1[%c0_2, %c0_3, %c0_4] : memref<1x32x512xf32, #tpu.memory_space<vmem>>, vector<1x32x512xf32>
    %3 = vector.shape_cast %2 : vector<1x32x512xf32> to vector<32x512xf32>
    %cst = arith.constant dense<0.000000e+00> : vector<32x512xf32>
    %4 = tpu.matmul %1, %3, %cst {dimension_numbers = #tpu.dot_dimension_numbers<[1], [0], [0], [1], [0, 0, 1, 1], [], []>} : vector<32x32xf32>, vector<32x512xf32>, vector<32x512xf32> -> vector<32x512xf32>
    %c0_5 = arith.constant 0 : index
    %c0_6 = arith.constant 0 : index
    %c0_7 = arith.constant 0 : index
    %5 = vector.load %arg3[%c0_5, %c0_6, %c0_7] : memref<1x32x1xf32, #tpu.memory_space<vmem>>, vector<1x32x1xf32>
    %6 = vector.shape_cast %5 : vector<1x32x1xf32> to vector<32x1xf32>
    %7 = vector.broadcast %6 : vector<32x1xf32> to vector<32x512xf32>
    %8 = arith.addf %4, %7 : vector<32x512xf32>
    %cst_8 = arith.constant 0.000000e+00 : f32
    %9 = vector.broadcast %cst_8 : f32 to vector<32x512xf32>
    %10 = arith.maximumf %8, %9 : vector<32x512xf32>
    %c0_9 = arith.constant 0 : index
    %c0_10 = arith.constant 0 : index
    %c0_11 = arith.constant 0 : index
    %11 = vector.load %arg6[%c0_9, %c0_10, %c0_11] : memref<1x512x2xf32, #tpu.memory_space<vmem>>, vector<1x512x2xf32>
    %12 = vector.shape_cast %11 : vector<1x512x2xf32> to vector<512x2xf32>
    %cst_12 = arith.constant dense<0.000000e+00> : vector<32x2xf32>
    %13 = tpu.matmul %10, %12, %cst_12 {dimension_numbers = #tpu.dot_dimension_numbers<[1], [0], [0], [1], [0, 0, 1, 1], [], []>} : vector<32x512xf32>, vector<512x2xf32>, vector<32x2xf32> -> vector<32x2xf32>
    %c0_13 = arith.constant 0 : index
    %c0_14 = arith.constant 0 : index
    %c0_15 = arith.constant 0 : index
    %14 = vector.load %arg4[%c0_13, %c0_14, %c0_15] : memref<1x32x32xf32, #tpu.memory_space<vmem>>, vector<1x32x32xf32>
    %15 = vector.shape_cast %14 : vector<1x32x32xf32> to vector<32x32xf32>
    %cst_16 = arith.constant dense<0.000000e+00> : vector<32x2xf32>
    %16 = tpu.matmul %15, %13, %cst_16 {dimension_numbers = #tpu.dot_dimension_numbers<[1], [0], [0], [1], [0, 0, 1, 1], [], []>} : vector<32x32xf32>, vector<32x2xf32>, vector<32x2xf32> -> vector<32x2xf32>
    %c0_17 = arith.constant 0 : index
    %c0_18 = arith.constant 0 : index
    %c0_19 = arith.constant 0 : index
    %17 = vector.load %arg5[%c0_17, %c0_18, %c0_19] : memref<1x32x1xf32, #tpu.memory_space<vmem>>, vector<1x32x1xf32>
    %18 = vector.shape_cast %17 : vector<1x32x1xf32> to vector<32x1xf32>
    %19 = vector.broadcast %18 : vector<32x1xf32> to vector<32x2xf32>
    %20 = arith.addf %16, %19 : vector<32x2xf32>
    %c0_20 = arith.constant 0 : index
    %c0_21 = arith.constant 0 : index
    %c0_22 = arith.constant 0 : index
    %21 = vector.load %arg7[%c0_20, %c0_21, %c0_22] : memref<1x32x2xf32, #tpu.memory_space<vmem>>, vector<1x32x2xf32>
    %22 = vector.shape_cast %21 : vector<1x32x2xf32> to vector<32x2xf32>
    %23 = vector.shape_cast %20 : vector<32x2xf32> to vector<1x32x2xf32>
    tpu.vector_store %arg7[%c0_20, %c0_21, %c0_22], %23 {strides = array<i32>} : memref<1x32x2xf32, #tpu.memory_space<vmem>>, vector<1x32x2xf32>,
    return
  }
  func.func @transform_0(%arg0: i32) -> (i32, i32, i32) {
    %c0_i32 = arith.constant 0 : i32
    %c0_i32_0 = arith.constant 0 : i32
    %c0_i32_1 = arith.constant 0 : i32
    return %arg0, %c0_i32, %c0_i32_0 : i32, i32, i32
  }
  func.func @transform_1(%arg0: i32) -> (i32, i32, i32) {
    %c0_i32 = arith.constant 0 : i32
    %c0_i32_0 = arith.constant 0 : i32
    %c0_i32_1 = arith.constant 0 : i32
    return %arg0, %c0_i32, %c0_i32_0 : i32, i32, i32
  }
  func.func @transform_2(%arg0: i32) -> (i32, i32, i32) {
    %c0_i32 = arith.constant 0 : i32
    %c0_i32_0 = arith.constant 0 : i32
    %c0_i32_1 = arith.constant 0 : i32
    return %arg0, %c0_i32, %c0_i32_0 : i32, i32, i32
  }
  func.func @transform_3(%arg0: i32) -> (i32, i32, i32) {
    %c0_i32 = arith.constant 0 : i32
    %c0_i32_0 = arith.constant 0 : i32
    %c0_i32_1 = arith.constant 0 : i32
    return %arg0, %c0_i32, %c0_i32_0 : i32, i32, i32
  }
  func.func @transform_4(%arg0: i32) -> (i32, i32, i32) {
    %c0_i32 = arith.constant 0 : i32
    %c0_i32_0 = arith.constant 0 : i32
    %c0_i32_1 = arith.constant 0 : i32
    return %arg0, %c0_i32, %c0_i32_0 : i32, i32, i32
  }
  func.func @transform_5(%arg0: i32) -> (i32, i32, i32) {
    %c0_i32 = arith.constant 0 : i32
    %c0_i32_0 = arith.constant 0 : i32
    %c0_i32_1 = arith.constant 0 : i32
    return %arg0, %c0_i32, %c0_i32_0 : i32, i32, i32
  }
  func.func @transform_6(%arg0: i32) -> (i32, i32, i32) {
    %c0_i32 = arith.constant 0 : i32
    %c0_i32_0 = arith.constant 0 : i32
    %c0_i32_1 = arith.constant 0 : i32
    return %arg0, %c0_i32, %c0_i32_0 : i32, i32, i32
  }
}

</mosaic_0001>

<bundles_post_ra>
// kernel: bimodal_encoder.1
= control target key start
LH: loop header
LB: loop body
LE: loop exit
PB: predicated region body
PF: predicated region fallthrough
CT: control target
= control target key end

     0   :  { %s1026_s21 = smov 0   ;;  %s1174_s0 = inlined_call_operand.vmem [shape: f32[2,32,512], index: 0, kind: input, shape index: {}]   ;;  %s1175_s1 = inlined_call_operand.vmem [shape: f32[2,32,32], index: 1, kind: input, shape index: {}]   ;;  %s1176_s2 = inlined_call_operand.vmem [shape: f32[2,32,1], index: 2, kind: input, shape index: {}]   ;;  %s1177_s3 = inlined_call_operand.vmem [shape: f32[2,32,32], index: 3, kind: input, shape index: {}]   ;;  %s1178_s4 = inlined_call_operand.vmem [shape: f32[2,32,1], index: 4, kind: input, shape index: {}]   ;;  %s1179_s5 = inlined_call_operand.vmem [shape: f32[2,512,2], index: 5, kind: input, shape index: {}]   ;;  %s1180_s6 = inlined_call_operand.vmem [shape: f32[2,32,2], index: 6, kind: output, shape index: {}]  }
   0x1 LB: > { %s910_s22 = sadd.s32 4294967295, %s988_s21   ;;  %p914_p0 = scmp.ge.s32.totalorder %s988_s21, 1  ;;  %s988_s21 = sphi %s1026_s21, %s16_s21  }
   0x2   : > { %p262_p1 = scmp.lt.s32.totalorder %s988_s21, 3 }
   0x4   : > { %p263_p2 = pnand %p914_p0, %p262_p1 }
   0x5   : > { %p317_p3 = scmp.lt.s32.totalorder (!%p263_p2), %s910_s22, 1 }
   0x6   : > { %266 = sbr.rel (%p263_p2) target bundleno = 464 (0x1d0), region = 44 }
   0xb   : > { %v990_v0 = vmov 0   ;;  %s1182_s22 = smov (!%p317_p3, %s910_s22), 1  ;;  %vm396_vm0 = vcmask 261120   ;;  %vm790_vm1 = vcmask 15360  }
   0xc   : > { %979 = vset.pattern.permute.xlu0 %v990_v0  ;;  %980 = vset.pattern.permute.xlu1 %v990_v0  ;;  %s951_s23 = sshll.u32 %s1182_s22, 7  ;;  %s1041_s27 = sshll.u32 %s1182_s22, 5 }
   0xd   : > { %981 = vset.pattern.permute.xlu2 %v990_v0  ;;  %s321_s26 = scalar_lea.vmem %s1174_s0, %s951_s23  ;;  %s956_s28 = sshll.u32 %s1182_s22, 9 }
   0xe   : > { %v368_v1 = vld [vmem:[%s321_s26 + $0x60] sm:$0xff]  ;;  %v369_v2 = vld [vmem:[%s321_s26 + $0x68] sm:$0xff]  ;;  %v370_v3 = vld [vmem:[%s321_s26 + $0x70] sm:$0xff]  ;;  %s1048_s7 = scalar_lea.vmem %s1175_s1, %s1041_s27  ;;  %s1054_s10 = scalar_lea.vmem %s1176_s2, %s1041_s27 }
   0xf   : > { %421 = vmatpush.msra.mxu0 %v368_v1  ;;  %450 = vmatpush.msra.mxu1 %v369_v2  ;;  %v371_v4 = vld [vmem:[%s321_s26 + $0x78] sm:$0xff]  ;;  %v364_v5 = vld [vmem:[%s321_s26 + $0x40] sm:$0xff]  ;;  %v365_v6 = vld [vmem:[%s321_s26 + $0x48] sm:$0xff]  ;;  %s1059_s13 = scalar_lea.vmem %s1179_s5, %s956_s28  ;;  %s1097_s16 = scalar_lea.vmem %s1178_s4, %s1041_s27 }
  0x10   : > { %479 = vmatpush.msra.mxu2 %v370_v3  ;;  %508 = vmatpush.msra.mxu3 %v371_v4  ;;  %v366_v7 = vld [vmem:[%s321_s26 + $0x50] sm:$0xff]  ;;  %v367_v8 = vld [vmem:[%s321_s26 + $0x58] sm:$0xff]  ;;  %v360_v9 = vld [vmem:[%s321_s26 + $0x20] sm:$0xff]  ;;  %s336_s19 = scalar_lea.vmem %s1177_s3, %s1041_s27  ;;  %s351_s23 = scalar_lea.vmem %s1180_s6, %s1041_s27 }
  0x11   : > { %422 = vmatpush.msra.mxu0 %v364_v5  ;;  %451 = vmatpush.msra.mxu1 %v365_v6  ;;  %v361_v10 = vld [vmem:[%s321_s26 + $0x28] sm:$0xff]  ;;  %v362_v11 = vld [vmem:[%s321_s26 + $0x30] sm:$0xff]  ;;  %v363_v12 = vld [vmem:[%s321_s26 + $0x38] sm:$0xff] }
  0x12   : > { %480 = vmatpush.msra.mxu2 %v366_v7  ;;  %509 = vmatpush.msra.mxu3 %v367_v8  ;;  %v356_v13 = vld [vmem:[%s321_s26] sm:$0xff]  ;;  %v357_v14 = vld [vmem:[%s321_s26 + $0x8] sm:$0xff]  ;;  %v358_v15 = vld [vmem:[%s321_s26 + $0x10] sm:$0xff] }
  0x13   : > { %423 = vmatpush.msra.mxu0 %v360_v9  ;;  %452 = vmatpush.msra.mxu1 %v361_v10  ;;  %v359_v16 = vld [vmem:[%s321_s26 + $0x18] sm:$0xff]  ;;  %v352_v17 = vld [vmem:[%s1048_s7] sm:$0xff]  ;;  %v374_v19 = vld [vmem:[%s1054_s10 + $0x10] sm:$0xff] }
  0x14   : > { %481 = vmatpush.msra.mxu2 %v362_v11  ;;  %510 = vmatpush.msra.mxu3 %v363_v12  ;;  %v372_v18 = vld [vmem:[%s1054_s10] sm:$0xff]  ;;  %v556_v20 = vld [vmem:[%s1059_s13 + $0x78] sm:$0xff]  ;;  %v555_v22 = vld [vmem:[%s1059_s13 + $0x70] sm:$0xff] }
  0x15   : > { %424 = vmatpush.msra.mxu0 %v356_v13  ;;  %453 = vmatpush.msra.mxu1 %v357_v14  ;;  %v572_v21 = vld [vmem:[%s1059_s13 + $0xf8] sm:$0xff]  ;;  %v571_v23 = vld [vmem:[%s1059_s13 + $0xf0] sm:$0xff]  ;;  %v554_v27 = vld [vmem:[%s1059_s13 + $0x68] sm:$0xff] }
  0x16   : > { %482 = vmatpush.msra.mxu2 %v358_v15  ;;  %511 = vmatpush.msra.mxu3 %v359_v16  ;;  %v588_v24 = vld [vmem:[%s1059_s13 + $0x178] sm:$0xff]  ;;  %v587_v26 = vld [vmem:[%s1059_s13 + $0x170] sm:$0xff]  ;;  %v570_v28 = vld [vmem:[%s1059_s13 + $0xe8] sm:$0xff] }
  0x17   : > { %929 = vmatmul.msk.f32.vlgmr.msra.gmra.mxu0 %vm396_vm0, %v352_v17  ;;  %933 = vmatmul.msk.f32.vlgmr.msra.gmra.mxu1 %vm396_vm0, %v352_v17  ;;  %v604_v25 = vld [vmem:[%s1059_s13 + $0x1f8] sm:$0xff]  ;;  %v603_v29 = vld [vmem:[%s1059_s13 + $0x1f0] sm:$0xff]  ;;  %v353_v30 = vld [vmem:[%s1048_s7 + $0x8] sm:$0xff] }
  0x18   : > { %937 = vmatmul.msk.f32.vlgmr.msra.gmra.mxu2 %vm396_vm0, %v352_v17  ;;  %941 = vmatmul.msk.f32.vlgmr.msra.gmra.mxu3 %vm396_vm0, %v352_v17  ;;  %v373_v31 = vld [vmem:[%s1054_s10 + $0x8] sm:$0xff]  ;;  %v375_v32 = vld [vmem:[%s1054_s10 + $0x18] sm:$0xff]  ;;  %v553_v33 = vld [vmem:[%s1059_s13 + $0x60] sm:$0xff] }
  0x19   : > { %378 = vperm.xlu0 %979, %v372_v18   ;;  %388 = vperm.xlu1 %980, %v374_v19   ;;  %v569_v34 = vld [vmem:[%s1059_s13 + $0xe0] sm:$0xff]  ;;  %v586_v35 = vld [vmem:[%s1059_s13 + $0x168] sm:$0xff]  ;;  %v552_v37 = vld [vmem:[%s1059_s13 + $0x58] sm:$0xff] }
  0x1a   : > { %605 = vmatpush.msrb.mxu0 %v556_v20  ;;  %634 = vmatpush.msrb.mxu1 %v572_v21  ;;  %v602_v36 = vld [vmem:[%s1059_s13 + $0x1e8] sm:$0xff]  ;;  %v568_v38 = vld [vmem:[%s1059_s13 + $0xd8] sm:$0xff]  ;;  %v585_v39 = vld [vmem:[%s1059_s13 + $0x160] sm:$0xff] }
  0x1b   : > { %663 = vmatpush.msrb.mxu2 %v588_v24  ;;  %692 = vmatpush.msrb.mxu3 %v604_v25  ;;  %v601_v40 = vld [vmem:[%s1059_s13 + $0x1e0] sm:$0xff]  ;;  %v551_v41 = vld [vmem:[%s1059_s13 + $0x50] sm:$0xff]  ;;  %v728_v45 = vld [vmem:[%s1097_s16 + $0x18] sm:$0xff] }
  0x1c   : > { %606 = vmatpush.msrb.mxu0 %v555_v22  ;;  %635 = vmatpush.msrb.mxu1 %v571_v23  ;;  %v567_v42 = vld [vmem:[%s1059_s13 + $0xd0] sm:$0xff]  ;;  %v550_v46 = vld [vmem:[%s1059_s13 + $0x48] sm:$0xff]  ;;  %v584_v48 = vld [vmem:[%s1059_s13 + $0x158] sm:$0xff] }
  0x1d   : > { %664 = vmatpush.msrb.mxu2 %v587_v26  ;;  %693 = vmatpush.msrb.mxu3 %v603_v29  ;;  %v354_v43 = vld [vmem:[%s1048_s7 + $0x10] sm:$0xff]  ;;  %v566_v47 = vld [vmem:[%s1059_s13 + $0xc8] sm:$0xff]  ;;  %v600_v49 = vld [vmem:[%s1059_s13 + $0x1d8] sm:$0xff] }
  0x1e   : > { %607 = vmatpush.msrb.mxu0 %v554_v27  ;;  %636 = vmatpush.msrb.mxu1 %v570_v28  ;;  %v727_v44 = vld [vmem:[%s1097_s16 + $0x10] sm:$0xff]  ;;  %v549_v50 = vld [vmem:[%s1059_s13 + $0x40] sm:$0xff]  ;;  %v355_v52 = vld [vmem:[%s1048_s7 + $0x18] sm:$0xff] }
  0x1f   : > { %930 = vmatmul.msk.f32.gmra.mxu0 %vm396_vm0, %v353_v30  ;;  %934 = vmatmul.msk.f32.gmra.mxu1 %vm396_vm0, %v353_v30  ;;  %v565_v51 = vld [vmem:[%s1059_s13 + $0xc0] sm:$0xff]  ;;  %v548_v53 = vld [vmem:[%s1059_s13 + $0x38] sm:$0xff]  ;;  %v583_v55 = vld [vmem:[%s1059_s13 + $0x150] sm:$0xff] }
  0x20   : > { %938 = vmatmul.msk.f32.gmra.mxu2 %vm396_vm0, %v353_v30  ;;  %942 = vmatmul.msk.f32.gmra.mxu3 %vm396_vm0, %v353_v30  ;;  %v564_v54 = vld [vmem:[%s1059_s13 + $0xb8] sm:$0xff]  ;;  %v599_v56 = vld [vmem:[%s1059_s13 + $0x1d0] sm:$0xff]  ;;  %v582_v59 = vld [vmem:[%s1059_s13 + $0x148] sm:$0xff] }
  0x21   : > { %383 = vperm.xlu0 %979, %v373_v31   ;;  %393 = vperm.xlu1 %980, %v375_v32   ;;  %v547_v57 = vld [vmem:[%s1059_s13 + $0x30] sm:$0xff]  ;;  %v598_v60 = vld [vmem:[%s1059_s13 + $0x1c8] sm:$0xff]  ;;  %v581_v63 = vld [vmem:[%s1059_s13 + $0x140] sm:$0xff] }
  0x22   : > { %608 = vmatpush.msrb.mxu0 %v553_v33  ;;  %637 = vmatpush.msrb.mxu1 %v569_v34  ;;  %v563_v58 = vld [vmem:[%s1059_s13 + $0xb0] sm:$0xff]  ;;  %v546_v61 = vld [vmem:[%s1059_s13 + $0x28] sm:$0xff]  ;;  %v597_v0 = vld [vmem:[%s1059_s13 + $0x1c0] sm:$0xff] }
  0x23   : > { %665 = vmatpush.msrb.mxu2 %v586_v35  ;;  %694 = vmatpush.msrb.mxu3 %v602_v36  ;;  %v562_v62 = vld [vmem:[%s1059_s13 + $0xa8] sm:$0xff]  ;;  %v545_v1 = vld [vmem:[%s1059_s13 + $0x20] sm:$0xff]  ;;  %v580_v3 = vld [vmem:[%s1059_s13 + $0x138] sm:$0xff] }
  0x24   : > { %609 = vmatpush.msrb.mxu0 %v552_v37  ;;  %638 = vmatpush.msrb.mxu1 %v568_v38  ;;  %v561_v2 = vld [vmem:[%s1059_s13 + $0xa0] sm:$0xff]  ;;  %v596_v4 = vld [vmem:[%s1059_s13 + $0x1b8] sm:$0xff]  ;;  %v579_v7 = vld [vmem:[%s1059_s13 + $0x130] sm:$0xff] }
  0x25   : > { %666 = vmatpush.msrb.mxu2 %v585_v39  ;;  %695 = vmatpush.msrb.mxu3 %v601_v40  ;;  %v544_v5 = vld [vmem:[%s1059_s13 + $0x18] sm:$0xff]  ;;  %v595_v8 = vld [vmem:[%s1059_s13 + $0x1b0] sm:$0xff]  ;;  %v578_v11 = vld [vmem:[%s1059_s13 + $0x128] sm:$0xff] }
  0x26   : > { %610 = vmatpush.msrb.mxu0 %v551_v41  ;;  %639 = vmatpush.msrb.mxu1 %v567_v42  ;;  %v560_v6 = vld [vmem:[%s1059_s13 + $0x98] sm:$0xff]  ;;  %v543_v9 = vld [vmem:[%s1059_s13 + $0x10] sm:$0xff]  ;;  %v594_v12 = vld [vmem:[%s1059_s13 + $0x1a8] sm:$0xff] }
  0x27   : > { %931 = vmatmul.msk.f32.gmra.mxu0 %vm396_vm0, %v354_v43  ;;  %935 = vmatmul.msk.f32.gmra.mxu1 %vm396_vm0, %v354_v43  ;;  %v559_v10 = vld [vmem:[%s1059_s13 + $0x90] sm:$0xff]  ;;  %v542_v13 = vld [vmem:[%s1059_s13 + $0x8] sm:$0xff]  ;;  %v577_v15 = vld [vmem:[%s1059_s13 + $0x120] sm:$0xff] }
  0x28   : > { %939 = vmatmul.msk.f32.gmra.mxu2 %vm396_vm0, %v354_v43  ;;  %943 = vmatmul.msk.f32.gmra.mxu3 %vm396_vm0, %v354_v43  ;;  %v558_v14 = vld [vmem:[%s1059_s13 + $0x88] sm:$0xff]  ;;  %v593_v16 = vld [vmem:[%s1059_s13 + $0x1a0] sm:$0xff]  ;;  %v576_v19 = vld [vmem:[%s1059_s13 + $0x118] sm:$0xff] }
  0x29   : > { %741 = vperm.xlu0 %979, %v727_v44   ;;  %746 = vperm.xlu1 %980, %v728_v45   ;;  %v541_v17 = vld [vmem:[%s1059_s13] sm:$0xff]  ;;  %v592_v20 = vld [vmem:[%s1059_s13 + $0x198] sm:$0xff]  ;;  %v575_v21 = vld [vmem:[%s1059_s13 + $0x110] sm:$0xff] }
  0x2a   : > { %611 = vmatpush.msrb.mxu0 %v550_v46  ;;  %640 = vmatpush.msrb.mxu1 %v566_v47  ;;  %v557_v18 = vld [vmem:[%s1059_s13 + $0x80] sm:$0xff]  ;;  %v591_v22 = vld [vmem:[%s1059_s13 + $0x190] sm:$0xff]  ;;  %v574_v23 = vld [vmem:[%s1059_s13 + $0x108] sm:$0xff] }
  0x2b   : > { %667 = vmatpush.msrb.mxu2 %v584_v48  ;;  %696 = vmatpush.msrb.mxu3 %v600_v49  ;;  %v590_v24 = vld [vmem:[%s1059_s13 + $0x188] sm:$0xff]  ;;  %v573_v25 = vld [vmem:[%s1059_s13 + $0x100] sm:$0xff] }
  0x2c   : > { %612 = vmatpush.msrb.mxu0 %v549_v50  ;;  %641 = vmatpush.msrb.mxu1 %v565_v51  ;;  %v589_v26 = vld [vmem:[%s1059_s13 + $0x180] sm:$0xff] }
  0x2d   : > { %668 = vmatpush.msrb.mxu2 %v583_v55  ;;  %697 = vmatpush.msrb.mxu3 %v599_v56 }
  0x2e   : > { %613 = vmatpush.msrb.mxu0 %v548_v53  ;;  %642 = vmatpush.msrb.mxu1 %v564_v54 }
  0x2f   : > { %932 = vmatmul.msk.f32.gmra.mxu0 %vm396_vm0, %v355_v52  ;;  %936 = vmatmul.msk.f32.gmra.mxu1 %vm396_vm0, %v355_v52 }
  0x30   : > { %940 = vmatmul.msk.f32.gmra.mxu2 %vm396_vm0, %v355_v52  ;;  %944 = vmatmul.msk.f32.gmra.mxu3 %vm396_vm0, %v355_v52 }
  0x31   : > { %614 = vmatpush.msrb.mxu0 %v547_v57  ;;  %643 = vmatpush.msrb.mxu1 %v563_v58 }
  0x32   : > { %669 = vmatpush.msrb.mxu2 %v582_v59  ;;  %698 = vmatpush.msrb.mxu3 %v598_v60 }
  0x33   : > { %615 = vmatpush.msrb.mxu0 %v546_v61  ;;  %644 = vmatpush.msrb.mxu1 %v562_v62 }
  0x34   : > { %670 = vmatpush.msrb.mxu2 %v581_v63  ;;  %699 = vmatpush.msrb.mxu3 %v597_v0 }
  0x35   : > { %616 = vmatpush.msrb.mxu0 %v545_v1  ;;  %645 = vmatpush.msrb.mxu1 %v561_v2 }
  0x36   : > { %671 = vmatpush.msrb.mxu2 %v580_v3  ;;  %700 = vmatpush.msrb.mxu3 %v596_v4 }
  0x37   : > { %617 = vmatpush.msrb.mxu0 %v544_v5  ;;  %646 = vmatpush.msrb.mxu1 %v560_v6 }
  0x38   : > { %672 = vmatpush.msrb.mxu2 %v579_v7  ;;  %701 = vmatpush.msrb.mxu3 %v595_v8 }
  0x39   : > { %618 = vmatpush.msrb.mxu0 %v543_v9  ;;  %647 = vmatpush.msrb.mxu1 %v559_v10 }
  0x3a   : > { %673 = vmatpush.msrb.mxu2 %v578_v11  ;;  %702 = vmatpush.msrb.mxu3 %v594_v12 }
  0x3b   : > { %619 = vmatpush.msrb.mxu0 %v542_v13  ;;  %648 = vmatpush.msrb.mxu1 %v558_v14 }
  0x3c   : > { %674 = vmatpush.msrb.mxu2 %v577_v15  ;;  %703 = vmatpush.msrb.mxu3 %v593_v16 }
  0x3d   : > { %620 = vmatpush.msrb.mxu0 %v541_v17  ;;  %649 = vmatpush.msrb.mxu1 %v557_v18 }
  0x3e   : > { %675 = vmatpush.msrb.mxu2 %v576_v19  ;;  %704 = vmatpush.msrb.mxu3 %v592_v20 }
  0x40   : > { %676 = vmatpush.msrb.mxu2 %v575_v21  ;;  %705 = vmatpush.msrb.mxu3 %v591_v22  ;;  %v725_v21 = vld [vmem:[%s1097_s16] sm:$0xff] }
  0x41   : > { %731 = vperm.xlu2 %981, %v725_v21  }
  0x42   : > { %677 = vmatpush.msrb.mxu2 %v574_v23  ;;  %706 = vmatpush.msrb.mxu3 %v590_v24 }
  0x44   : > { %678 = vmatpush.msrb.mxu2 %v573_v25  ;;  %707 = vmatpush.msrb.mxu3 %v589_v26  ;;  %v726_v26 = vld [vmem:[%s1097_s16 + $0x8] sm:$0xff] }
  0x49   : > { %736 = vperm.xlu2 %981, %v726_v26  }
  0x8b   : > { %v379_v27 = vpop.permute.xlu0 %378  ;;  %v389_v47 = vpop.permute.xlu1 %388 }
  0x93   : > { %v384_v34 = vpop.permute.xlu0 %383  ;;  %v394_v60 = vpop.permute.xlu1 %393 }
  0x94   : > { %v426_v28 = vpop.f32.mrf.mxu0  ;;  %v455_v29 = vpop.f32.mrf.mxu1 }
  0x95   : > { %v427_v30 = vadd.f32 %v426_v28, %v379_v27  ;;  %v456_v31 = vadd.f32 %v455_v29, %v379_v27 }
  0x97   : > { %v525_v32 = vmax.f32 %v427_v30, 0.0  ;;  %v526_v33 = vmax.f32 %v456_v31, 0.0 }
  0x99   : > { %621 = vmatmul.f32.vlgmr.msrb.gmra.mxu0 %v525_v32  ;;  %650 = vmatmul.f32.vlgmr.msrb.gmra.mxu1 %v526_v33 }
  0x9b   : > { %v484_v35 = vpop.f32.mrf.mxu2  ;;  %v513_v37 = vpop.f32.mrf.mxu3 }
  0x9c   : > { %v485_v36 = vadd.f32 %v484_v35, %v379_v27  ;;  %v429_v38 = vpop.f32.mrf.mxu0  ;;  %v514_v39 = vadd.f32 %v513_v37, %v379_v27  ;;  %v458_v41 = vpop.f32.mrf.mxu1 }
  0x9d   : > { %v430_v40 = vadd.f32 %v429_v38, %v384_v34  ;;  %v459_v43 = vadd.f32 %v458_v41, %v384_v34 }
  0x9e   : > { %v527_v42 = vmax.f32 %v485_v36, 0.0  ;;  %v528_v44 = vmax.f32 %v514_v39, 0.0 }
  0x9f   : > { %v529_v45 = vmax.f32 %v430_v40, 0.0  ;;  %v530_v46 = vmax.f32 %v459_v43, 0.0 }
  0xa0   : > { %679 = vmatmul.f32.vlgmr.msrb.gmra.mxu2 %v527_v42  ;;  %708 = vmatmul.f32.vlgmr.msrb.gmra.mxu3 %v528_v44 }
  0xa1   : > { %624 = vmatmul.f32.gmra.mxu0 %v529_v45  ;;  %653 = vmatmul.f32.gmra.mxu1 %v530_v46  ;;  %v723_v45 = vld [vmem:[%s336_s19 + $0x10] sm:$0xff]  ;;  %v724_v46 = vld [vmem:[%s336_s19 + $0x18] sm:$0xff] }
  0xa3   : > { %v487_v48 = vpop.f32.mrf.mxu2  ;;  %v516_v50 = vpop.f32.mrf.mxu3 }
  0xa4   : > { %v488_v49 = vadd.f32 %v487_v48, %v384_v34  ;;  %v432_v51 = vpop.f32.mrf.mxu0  ;;  %v517_v52 = vadd.f32 %v516_v50, %v384_v34  ;;  %v461_v54 = vpop.f32.mrf.mxu1  ;;  %v722_v48 = vld [vmem:[%s336_s19 + $0x8] sm:$0xff] }
  0xa5   : > { %v433_v53 = vadd.f32 %v432_v51, %v389_v47  ;;  %v462_v56 = vadd.f32 %v461_v54, %v389_v47 }
  0xa6   : > { %v531_v55 = vmax.f32 %v488_v49, 0.0  ;;  %v532_v57 = vmax.f32 %v517_v52, 0.0  ;;  %v732_v49 = vpop.permute.xlu2 %731 }
  0xa7   : > { %v533_v58 = vmax.f32 %v433_v53, 0.0  ;;  %v534_v59 = vmax.f32 %v462_v56, 0.0  ;;  %v747_v56 = vpop.permute.xlu1 %746 }
  0xa8   : > { %682 = vmatmul.f32.gmra.mxu2 %v531_v55  ;;  %711 = vmatmul.f32.gmra.mxu3 %v532_v57  ;;  %v742_v55 = vpop.permute.xlu0 %741 }
  0xa9   : > { %627 = vmatmul.f32.gmra.mxu0 %v533_v58  ;;  %656 = vmatmul.f32.gmra.mxu1 %v534_v59 }
  0xab   : > { %v490_v61 = vpop.f32.mrf.mxu2  ;;  %v519_v63 = vpop.f32.mrf.mxu3 }
  0xac   : > { %v491_v62 = vadd.f32 %v490_v61, %v389_v47  ;;  %v435_v0 = vpop.f32.mrf.mxu0  ;;  %v520_v1 = vadd.f32 %v519_v63, %v389_v47  ;;  %v464_v3 = vpop.f32.mrf.mxu1  ;;  %v721_v47 = vld [vmem:[%s336_s19] sm:$0xff] }
  0xad   : > { %v436_v2 = vadd.f32 %v435_v0, %v394_v60  ;;  %v465_v5 = vadd.f32 %v464_v3, %v394_v60 }
  0xae   : > { %v535_v4 = vmax.f32 %v491_v62, 0.0  ;;  %v536_v6 = vmax.f32 %v520_v1, 0.0  ;;  %v737_v50 = vpop.permute.xlu2 %736 }
  0xaf   : > { %v537_v7 = vmax.f32 %v436_v2, 0.0  ;;  %v538_v8 = vmax.f32 %v465_v5, 0.0 }
  0xb0   : > { %685 = vmatmul.f32.gmra.mxu2 %v535_v4  ;;  %714 = vmatmul.f32.gmra.mxu3 %v536_v6 }
  0xb1   : > { %630 = vmatmul.f32.gmra.mxu0 %v537_v7  ;;  %659 = vmatmul.f32.gmra.mxu1 %v538_v8 }
  0xb3   : > { %v493_v9 = vpop.f32.mrf.mxu2  ;;  %v522_v11 = vpop.f32.mrf.mxu3 }
  0xb4   : > { %v494_v10 = vadd.f32 %v493_v9, %v394_v60  ;;  %v523_v12 = vadd.f32 %v522_v11, %v394_v60 }
  0xb6   : > { %v539_v13 = vmax.f32 %v494_v10, 0.0  ;;  %v540_v14 = vmax.f32 %v523_v12, 0.0 }
  0xb8   : > { %688 = vmatmul.f32.gmra.mxu2 %v539_v13  ;;  %717 = vmatmul.f32.gmra.mxu3 %v540_v14 }
 0x116   : > { %v622_v15 = vpop.f32.mrf.mxu0  ;;  %v651_v16 = vpop.f32.mrf.mxu1 }
 0x117   : > { %v652_v38 = vadd.f32 %v651_v16, %v622_v15 }
 0x11e   : > { %v625_v17 = vpop.f32.mrf.mxu0  ;;  %v654_v18 = vpop.f32.mrf.mxu1 }
 0x11f   : > { %v655_v34 = vadd.f32 %v654_v18, %v625_v17 }
 0x123   : > { %v680_v19 = vpop.f32.mrf.mxu2  ;;  %v709_v20 = vpop.f32.mrf.mxu3 }
 0x124   : > { %v681_v41 = vadd.f32 %v680_v19, %v652_v38 }
 0x126   : > { %v628_v24 = vpop.f32.mrf.mxu0  ;;  %v657_v25 = vpop.f32.mrf.mxu1  ;;  %v710_v44 = vadd.f32 %v709_v20, %v681_v41 }
 0x127   : > { %v658_v31 = vadd.f32 %v657_v25, %v628_v24 }
 0x12b   : > { %v683_v22 = vpop.f32.mrf.mxu2  ;;  %v712_v23 = vpop.f32.mrf.mxu3 }
 0x12c   : > { %v684_v39 = vadd.f32 %v683_v22, %v655_v34 }
 0x12e   : > { %v631_v29 = vpop.f32.mrf.mxu0  ;;  %v660_v30 = vpop.f32.mrf.mxu1  ;;  %v713_v43 = vadd.f32 %v712_v23, %v684_v39 }
 0x12f   : > { %v661_v32 = vadd.f32 %v660_v30, %v631_v29 }
 0x133   : > { %v686_v27 = vpop.f32.mrf.mxu2  ;;  %v715_v28 = vpop.f32.mrf.mxu3 }
 0x134   : > { %v687_v35 = vadd.f32 %v686_v27, %v658_v31 }
 0x136   : > { %v716_v42 = vadd.f32 %v715_v28, %v687_v35 }
 0x13b   : > { %v689_v33 = vpop.f32.mrf.mxu2  ;;  %v718_v37 = vpop.f32.mrf.mxu3 }
 0x13c   : > { %v690_v36 = vadd.f32 %v689_v33, %v661_v32 }
 0x13e   : > { %v719_v40 = vadd.f32 %v718_v37, %v690_v36 }
 0x140   : > { %773 = vmatpush.msra.mxu0 %v719_v40  ;;  %958 = vmatpush.msra.mxu1 %v719_v40 }
 0x141   : > { %959 = vmatpush.msra.mxu2 %v719_v40  ;;  %960 = vmatpush.msra.mxu3 %v719_v40 }
 0x142   : > { %774 = vmatpush.msra.mxu0 %v716_v42  ;;  %961 = vmatpush.msra.mxu1 %v716_v42 }
 0x143   : > { %962 = vmatpush.msra.mxu2 %v716_v42  ;;  %963 = vmatpush.msra.mxu3 %v716_v42 }
 0x144   : > { %775 = vmatpush.msra.mxu0 %v713_v43  ;;  %964 = vmatpush.msra.mxu1 %v713_v43 }
 0x145   : > { %965 = vmatpush.msra.mxu2 %v713_v43  ;;  %966 = vmatpush.msra.mxu3 %v713_v43 }
 0x146   : > { %776 = vmatpush.msra.mxu0 %v710_v44  ;;  %967 = vmatpush.msra.mxu1 %v710_v44 }
 0x147   : > { %968 = vmatpush.msra.mxu2 %v710_v44  ;;  %969 = vmatpush.msra.mxu3 %v710_v44 }
 0x148   : > { %947 = vmatmul.msk.f32.vlgmr.msra.gmra.mxu2 %vm396_vm0, %v723_v45  ;;  %948 = vmatmul.msk.f32.vlgmr.msra.gmra.mxu3 %vm396_vm0, %v724_v46 }
 0x149   : > { %945 = vmatmul.msk.f32.vlgmr.msra.gmra.mxu0 %vm396_vm0, %v721_v47  ;;  %946 = vmatmul.msk.f32.vlgmr.msra.gmra.mxu1 %vm396_vm0, %v722_v48 }
 0x1c6   : > { %v778_v51 = vpop.f32.mrf.mxu0  ;;  %v781_v52 = vpop.f32.mrf.mxu1 }
 0x1c7   : > { %v779_v53 = vadd.f32 %v778_v51, %v732_v49  ;;  %v782_v54 = vadd.f32 %v781_v52, %v737_v50 }
 0x1c9   : > { %791 = vst.msk [vmem:[%s351_s23] sm:$0xff] %vm790_vm1, %v779_v53 }
 0x1ca   : > { %792 = vst.msk [vmem:[%s351_s23 + $0x8] sm:$0xff] %vm790_vm1, %v782_v54 }
 0x1cb   : > { %v784_v57 = vpop.f32.mrf.mxu2  ;;  %v787_v58 = vpop.f32.mrf.mxu3 }
 0x1cc   : > { %v785_v59 = vadd.f32 %v784_v57, %v742_v55  ;;  %v788_v60 = vadd.f32 %v787_v58, %v747_v56 }
 0x1ce   : > { %793 = vst.msk [vmem:[%s351_s23 + $0x10] sm:$0xff] %vm790_vm1, %v785_v59 }
 0x1cf   : > { %794 = vst.msk [vmem:[%s351_s23 + $0x18] sm:$0xff] %vm790_vm1, %v788_v60 }
 0x1d0 PF: > { %s16_s21 = sadd.s32 1, %s988_s21  }
 0x1d1   : > { %p13_p4 = scmp.ge.s32.totalorder %s16_s21, 4  }
 0x1d3   :  { %15 = sbr.rel (!%p13_p4) target bundleno = 1 (0x1), region = 89 }

</bundles_post_ra>
